<compile_context>
chip_gen: v7x
topology: tpu7x:2x2x1
jax: 0.10.0
libtpu: 0.0.40
codegen_flags: <defaults>
</compile_context>

<pallas_src>
import functools

import jax
import jax.numpy as jnp
from jax.experimental import pallas as pl
from jax.experimental.pallas import tpu as pltpu

LANE = 128             # vreg lane width (last dim)
MAX_BLOCK_ROWS = 1024  # rows per grid step (multiple of 8)


def _round_up(x, m):
    return ((x + m - 1) // m) * m


def _focal_kernel(pred_ref, true_ref, out_ref, acc_ref, *,
                  gamma, alpha, denom, n_valid, block_rows, blocks_per_split):
    s = pl.program_id(0)   # core split axis ("parallel")
    i = pl.program_id(1)   # reduction axis  ("arbitrary")

    @pl.when(i == 0)
    def _():
        acc_ref[...] = jnp.zeros_like(acc_ref)

    x = pred_ref[...].astype(jnp.float32)   # logits
    t = true_ref[...].astype(jnp.float32)   # targets in [0, 1]

    # In-kernel validity mask (no mask array DMA'd from HBM).
    r = jax.lax.broadcasted_iota(jnp.int32, x.shape, 0)
    l = jax.lax.broadcasted_iota(jnp.int32, x.shape, 1)
    global_row = (s * blocks_per_split + i) * block_rows + r
    full_rows = n_valid // LANE
    rem = n_valid % LANE
    mask = (global_row < full_rows) | ((global_row == full_rows) & (l < rem))

    # BCEWithLogitsLoss, reduction='none' (stable form):
    #   max(x, 0) - x*t + log1p(exp(-|x|))
    e = jnp.exp(-jnp.abs(x))                      # reused below
    bce = jnp.maximum(x, 0.0) - x * t + jnp.log1p(e)

    # sigmoid(x) derived from the same exp(-|x|) (no second exp)
    inv_1pe = 1.0 / (1.0 + e)
    sig = jnp.where(x >= 0.0, inv_1pe, e * inv_1pe)

    # Focal modulation
    p_t = t * sig + (1.0 - t) * (1.0 - sig)
    alpha_factor = t * alpha + (1.0 - t) * (1.0 - alpha)
    one_m = 1.0 - p_t
    if gamma == 1.5:
        mod = one_m * jnp.sqrt(one_m)             # (1-p_t)^1.5 without exp/log
    elif gamma == 2.0:
        mod = one_m * one_m
    elif gamma == 1.0:
        mod = one_m
    elif gamma == 0.0:
        mod = jnp.ones_like(one_m)
    else:
        mod = jnp.power(one_m, gamma)

    loss = jnp.where(mask, bce * alpha_factor * mod, 0.0)

    # Per-lane accumulator: sublane reduce per step, lane reduce deferred.
    acc_ref[...] += jnp.sum(loss, axis=0, keepdims=True)

    @pl.when(i == pl.num_programs(1) - 1)
    def _():
        out_ref[...] = acc_ref[...] / denom


def focal_loss(pred, true, gamma=1.5, alpha=0.25, reduction="mean"):
    """Pallas FocalLoss(BCEWithLogitsLoss)(pred, true). Returns a scalar."""
    assert pred.shape == true.shape
    n = pred.size

    if reduction == "mean":
        denom = float(n)
    elif reduction == "sum":
        denom = 1.0
    else:
        # TODO(synk): reduction='none' would need an elementwise output path;
        # YOLO uses 'mean' (the nn.BCEWithLogitsLoss default), implemented here.
        raise NotImplementedError("only 'mean' and 'sum' reductions supported")

    rows = pl.cdiv(n, LANE)
    # Use both TensorCores (v7x megacore) only when there is enough work.
    num_splits = 2 if rows >= 2 * MAX_BLOCK_ROWS else 1
    block_rows = min(MAX_BLOCK_ROWS, _round_up(pl.cdiv(rows, num_splits), 8))
    blocks_per_split = pl.cdiv(rows, num_splits * block_rows)
    padded_rows = num_splits * blocks_per_split * block_rows

    # Keep inputs in native dtype for the DMA; cast to f32 inside the kernel.
    flat_p = pred.reshape(-1)
    flat_t = true.reshape(-1)
    pad = padded_rows * LANE - n
    if pad:
        flat_p = jnp.pad(flat_p, (0, pad))
        flat_t = jnp.pad(flat_t, (0, pad))
    p2 = flat_p.reshape(padded_rows, LANE)
    t2 = flat_t.reshape(padded_rows, LANE)

    kernel = functools.partial(
        _focal_kernel, gamma=float(gamma), alpha=float(alpha), denom=denom,
        n_valid=int(n), block_rows=int(block_rows),
        blocks_per_split=int(blocks_per_split))

    in_map = lambda s, i: (s * blocks_per_split + i, 0)

    bytes_accessed = (p2.size * p2.dtype.itemsize
                      + t2.size * t2.dtype.itemsize
                      + num_splits * LANE * 4)
    cost = pl.CostEstimate(flops=20 * n, transcendentals=3 * n,
                           bytes_accessed=bytes_accessed)

    out = pl.pallas_call(
        kernel,
        out_shape=jax.ShapeDtypeStruct((1, num_splits * LANE), jnp.float32),
        grid_spec=pltpu.PrefetchScalarGridSpec(
            num_scalar_prefetch=0,
            grid=(num_splits, blocks_per_split),
            in_specs=[
                pl.BlockSpec((block_rows, LANE), in_map),
                pl.BlockSpec((block_rows, LANE), in_map),
            ],
            out_specs=pl.BlockSpec((1, LANE), lambda s, i: (0, s)),
            scratch_shapes=[pltpu.VMEM((1, LANE), jnp.float32)],
        ),
        compiler_params=pltpu.CompilerParams(
            dimension_semantics=("parallel", "arbitrary")),
        cost_estimate=cost,
    )(p2, t2)

    # Final (tiny) lane/split reduction outside the kernel.
    return jnp.sum(out)


def _focal_loss_ref(pred, true, gamma=1.5, alpha=0.25):
    """Pure-JAX reference mirroring the PyTorch module (BCEWithLogits, mean)."""
    x = pred.astype(jnp.float32)
    t = true.astype(jnp.float32)
    bce = jnp.maximum(x, 0.0) - x * t + jnp.log1p(jnp.exp(-jnp.abs(x)))
    p = jax.nn.sigmoid(x)
    p_t = t * p + (1.0 - t) * (1.0 - p)
    alpha_factor = t * alpha + (1.0 - t) * (1.0 - alpha)
    mod = jnp.power(1.0 - p_t, gamma)
    return jnp.mean(bce * alpha_factor * mod)


if __name__ == "__main__":
    key = jax.random.PRNGKey(0)
    k_pred, k_true = jax.random.split(key)

    # NCHW like a YOLO classification/objectness head: (batch, channels, H, W)
    shape = (2, 4, 16, 16)
    pred = jax.random.normal(k_pred, shape, dtype=jnp.float32)            # logits
    true = (jax.random.uniform(k_true, shape) < 0.3).astype(jnp.float32)  # {0,1}

    out = focal_loss(pred, true, gamma=1.5, alpha=0.25, reduction="mean")
    out = jax.block_until_ready(out)

    ref = _focal_loss_ref(pred, true, gamma=1.5, alpha=0.25)
    assert jnp.allclose(out, ref, rtol=1e-5, atol=1e-6), (out, ref)

    print("KERNEL_OK")
</pallas_src>

<mosaic_0001>
module attributes {stable_mosaic.version = 11 : i64} {
  func.func @_focal_kernel(%arg0: i32, %arg1: i32, %arg2: memref<16x128xf32, #tpu.memory_space<vmem>>, %arg3: memref<16x128xf32, #tpu.memory_space<vmem>>, %arg4: memref<1x128xf32, #tpu.memory_space<vmem>>, %arg5: memref<1x128xf32, #tpu.memory_space<vmem>>) attributes {dimension_semantics = [#tpu.dimension_semantics<parallel>, #tpu.dimension_semantics<arbitrary>], iteration_bounds = array<i64: 1, 1>, scalar_prefetch = 0 : i64, scratch_operands = 1 : i64, tpu.core_type = #tpu.core_type<tc>, window_params = [{transform_indices = @transform_0, window_bounds = array<i64: 16, 128>}, {transform_indices = @transform_1, window_bounds = array<i64: 16, 128>}, {transform_indices = @transform_2, window_bounds = array<i64: 1, 128>}]} {
    %c0_i32 = arith.constant 0 : i32
    %0 = arith.cmpi eq, %arg1, %c0_i32 : i32
    %1 = arith.extui %0 : i1 to i32
    %c0_i32_0 = arith.constant 0 : i32
    %2 = arith.cmpi ne, %1, %c0_i32_0 : i32
    scf.if %2 {
      %cst_25 = arith.constant 0.000000e+00 : f32
      %68 = vector.broadcast %cst_25 : f32 to vector<1x128xf32>
      %c0_26 = arith.constant 0 : index
      %c0_27 = arith.constant 0 : index
      %69 = vector.load %arg5[%c0_26, %c0_27] : memref<1x128xf32, #tpu.memory_space<vmem>>, vector<1x128xf32>
      tpu.vector_store %arg5[%c0_26, %c0_27], %68 {strides = array<i32>} : memref<1x128xf32, #tpu.memory_space<vmem>>, vector<1x128xf32>,
    } else {
    }
    %c0 = arith.constant 0 : index
    %c0_1 = arith.constant 0 : index
    %3 = vector.load %arg2[%c0, %c0_1] : memref<16x128xf32, #tpu.memory_space<vmem>>, vector<16x128xf32>
    %c0_2 = arith.constant 0 : index
    %c0_3 = arith.constant 0 : index
    %4 = vector.load %arg3[%c0_2, %c0_3] : memref<16x128xf32, #tpu.memory_space<vmem>>, vector<16x128xf32>
    %5 = tpu.iota {dimensions = array<i32: 0>} : vector<16x128xi32>
    %6 = tpu.iota {dimensions = array<i32: 1>} : vector<16x128xi32>
    %c1_i32 = arith.constant 1 : i32
    %7 = arith.muli %arg0, %c1_i32 : i32
    %8 = arith.addi %7, %arg1 : i32
    %c16_i32 = arith.constant 16 : i32
    %9 = arith.muli %8, %c16_i32 : i32
    %10 = vector.broadcast %9 : i32 to vector<16x128xi32>
    %11 = arith.addi %10, %5 : vector<16x128xi32>
    %c16_i32_4 = arith.constant 16 : i32
    %12 = vector.broadcast %c16_i32_4 : i32 to vector<16x128xi32>
    %13 = arith.cmpi slt, %11, %12 : vector<16x128xi32>
    %c16_i32_5 = arith.constant 16 : i32
    %14 = vector.broadcast %c16_i32_5 : i32 to vector<16x128xi32>
    %15 = arith.cmpi eq, %11, %14 : vector<16x128xi32>
    %c0_i32_6 = arith.constant 0 : i32
    %16 = vector.broadcast %c0_i32_6 : i32 to vector<16x128xi32>
    %17 = arith.cmpi slt, %6, %16 : vector<16x128xi32>
    %18 = arith.andi %15, %17 : vector<16x128xi1>
    %19 = arith.ori %13, %18 : vector<16x128xi1>
    %20 = math.absf %3 : vector<16x128xf32>
    %cst = arith.constant 0.000000e+00 : f32
    %21 = vector.broadcast %cst : f32 to vector<16x128xf32>
    %22 = arith.subf %21, %20 : vector<16x128xf32>
    %23 = math.exp %22 : vector<16x128xf32>
    %cst_7 = arith.constant 0.000000e+00 : f32
    %24 = vector.broadcast %cst_7 : f32 to vector<16x128xf32>
    %25 = arith.maximumf %3, %24 : vector<16x128xf32>
    %26 = arith.mulf %3, %4 : vector<16x128xf32>
    %27 = arith.subf %25, %26 : vector<16x128xf32>
    %28 = math.log1p %23 : vector<16x128xf32>
    %29 = arith.addf %27, %28 : vector<16x128xf32>
    %cst_8 = arith.constant 1.000000e+00 : f32
    %30 = vector.broadcast %cst_8 : f32 to vector<16x128xf32>
    %31 = arith.addf %30, %23 : vector<16x128xf32>
    %cst_9 = arith.constant 1.000000e+00 : f32
    %32 = vector.broadcast %cst_9 : f32 to vector<16x128xf32>
    %33 = arith.divf %32, %31 : vector<16x128xf32>
    %cst_10 = arith.constant 0.000000e+00 : f32
    %34 = vector.broadcast %cst_10 : f32 to vector<16x128xf32>
    %35 = arith.cmpf oge, %3, %34 : vector<16x128xf32>
    %36 = arith.mulf %23, %33 : vector<16x128xf32>
    %37 = arith.select %35, %33, %36 : vector<16x128xi1>, vector<16x128xf32>
    %38 = arith.mulf %4, %37 : vector<16x128xf32>
    %cst_11 = arith.constant 1.000000e+00 : f32
    %39 = vector.broadcast %cst_11 : f32 to vector<16x128xf32>
    %40 = arith.subf %39, %4 : vector<16x128xf32>
    %cst_12 = arith.constant 1.000000e+00 : f32
    %41 = vector.broadcast %cst_12 : f32 to vector<16x128xf32>
    %42 = arith.subf %41, %37 : vector<16x128xf32>
    %43 = arith.mulf %40, %42 : vector<16x128xf32>
    %44 = arith.addf %38, %43 : vector<16x128xf32>
    %cst_13 = arith.constant 2.500000e-01 : f32
    %45 = vector.broadcast %cst_13 : f32 to vector<16x128xf32>
    %46 = arith.mulf %4, %45 : vector<16x128xf32>
    %cst_14 = arith.constant 1.000000e+00 : f32
    %47 = vector.broadcast %cst_14 : f32 to vector<16x128xf32>
    %48 = arith.subf %47, %4 : vector<16x128xf32>
    %cst_15 = arith.constant 7.500000e-01 : f32
    %49 = vector.broadcast %cst_15 : f32 to vector<16x128xf32>
    %50 = arith.mulf %48, %49 : vector<16x128xf32>
    %51 = arith.addf %46, %50 : vector<16x128xf32>
    %cst_16 = arith.constant 1.000000e+00 : f32
    %52 = vector.broadcast %cst_16 : f32 to vector<16x128xf32>
    %53 = arith.subf %52, %44 : vector<16x128xf32>
    %54 = math.sqrt %53 : vector<16x128xf32>
    %55 = arith.mulf %53, %54 : vector<16x128xf32>
    %56 = arith.mulf %29, %51 : vector<16x128xf32>
    %57 = arith.mulf %56, %55 : vector<16x128xf32>
    %cst_17 = arith.constant 0.000000e+00 : f32
    %58 = vector.broadcast %cst_17 : f32 to vector<16x128xf32>
    %59 = arith.select %19, %57, %58 : vector<16x128xi1>, vector<16x128xf32>
    %c0_18 = arith.constant 0 : index
    %c0_19 = arith.constant 0 : index
    %60 = vector.load %arg5[%c0_18, %c0_19] : memref<1x128xf32, #tpu.memory_space<vmem>>, vector<1x128xf32>
    %cst_20 = arith.constant dense<0.000000e+00> : vector<128xf32>
    %61 = vector.multi_reduction <add>, %59, %cst_20 [0] : vector<16x128xf32> to vector<128xf32>
    %62 = vector.shape_cast %61 : vector<128xf32> to vector<1x128xf32>
    %63 = arith.addf %60, %62 : vector<1x128xf32>
    %c0_21 = arith.constant 0 : index
    %c0_22 = arith.constant 0 : index
    %64 = vector.load %arg5[%c0_21, %c0_22] : memref<1x128xf32, #tpu.memory_space<vmem>>, vector<1x128xf32>
    tpu.vector_store %arg5[%c0_21, %c0_22], %63 {strides = array<i32>} : memref<1x128xf32, #tpu.memory_space<vmem>>, vector<1x128xf32>,
    %c0_i32_23 = arith.constant 0 : i32
    %65 = arith.cmpi eq, %arg1, %c0_i32_23 : i32
    %66 = arith.extui %65 : i1 to i32
    %c0_i32_24 = arith.constant 0 : i32
    %67 = arith.cmpi ne, %66, %c0_i32_24 : i32
    scf.if %67 {
      %c0_25 = arith.constant 0 : index
      %c0_26 = arith.constant 0 : index
      %68 = vector.load %arg5[%c0_25, %c0_26] : memref<1x128xf32, #tpu.memory_space<vmem>>, vector<1x128xf32>
      %cst_27 = arith.constant 2.048000e+03 : f32
      %69 = vector.broadcast %cst_27 : f32 to vector<1x128xf32>
      %70 = arith.divf %68, %69 : vector<1x128xf32>
      %c0_28 = arith.constant 0 : index
      %c0_29 = arith.constant 0 : index
      %71 = vector.load %arg4[%c0_28, %c0_29] : memref<1x128xf32, #tpu.memory_space<vmem>>, vector<1x128xf32>
      tpu.vector_store %arg4[%c0_28, %c0_29], %70 {strides = array<i32>} : memref<1x128xf32, #tpu.memory_space<vmem>>, vector<1x128xf32>,
    } else {
    }
    return
  }
  func.func @transform_0(%arg0: i32, %arg1: i32) -> (i32, i32) {
    %c1_i32 = arith.constant 1 : i32
    %0 = arith.muli %arg0, %c1_i32 : i32
    %1 = arith.addi %0, %arg1 : i32
    %c0_i32 = arith.constant 0 : i32
    %c0_i32_0 = arith.constant 0 : i32
    return %1, %c0_i32 : i32, i32
  }
  func.func @transform_1(%arg0: i32, %arg1: i32) -> (i32, i32) {
    %c1_i32 = arith.constant 1 : i32
    %0 = arith.muli %arg0, %c1_i32 : i32
    %1 = arith.addi %0, %arg1 : i32
    %c0_i32 = arith.constant 0 : i32
    %c0_i32_0 = arith.constant 0 : i32
    return %1, %c0_i32 : i32, i32
  }
  func.func @transform_2(%arg0: i32, %arg1: i32) -> (i32, i32) {
    %c0_i32 = arith.constant 0 : i32
    %c0_i32_0 = arith.constant 0 : i32
    return %c0_i32, %arg0 : i32, i32
  }
}

</mosaic_0001>

<bundles_post_ra>
// kernel: tpu_custom_call.1
= control target key start
LH: loop header
LB: loop body
LE: loop exit
PB: predicated region body
PF: predicated region fallthrough
CT: control target
= control target key end

     0   :  { %7 = vsyncpa [#allocation4], 0  ;;  %s356_s0 = inlined_call_operand.hbm [shape: f32[16,128], index: 0, kind: input, shape index: {}]   ;;  %s357_s1 = inlined_call_operand.hbm [shape: f32[16,128], index: 1, kind: input, shape index: {}]   ;;  %s358_s2 = inlined_call_operand.hbm [shape: f32[1,128], index: 2, kind: output, shape index: {}]  }
   0x1   :  { %8 = vsyncpa [#allocation7], 0 }
   0x2   :  { %9 = vsyncpa [#allocation5], 0  ;;  %s293_s9 = smov [#allocation3]   ;;  %s221_s13 = scalar_lea.hbm %s356_s0, 256 }
   0x3   :  { %s19_s10 = sshll.u32 %s293_s9, 4  ;;  %p222_p0 = scmp.ne.s32.totalorder %s356_s0, %s221_s13  ;;  %s20_s10 = int_to_ptr.vmem [resolvable:$true] %s19_s10 }
   0x4   :  { %p225_p1 = scmp.lt.u32.totalorder %s221_s13, %s356_s0 }
   0x6   :  { %p227_p2 = pnand %p225_p1, %p222_p0 }
   0x8   :  { %230 = shalt.err (!%p227_p2)
}
   0x9   :  { %s231_s18 = scalar_lea.vmem %s20_s10, 256  ;;  %p236_p4 = scmp.lt.s32.totalorder %s20_s10, %s20_s10 }
   0xa   :  { %p232_p3 = scmp.ne.s32.totalorder %s20_s10, %s231_s18  ;;  %p237_p5 = scmp.lt.s32.totalorder %s231_s18, %s231_s18 }
   0xc   :  { %p238_p6 = por %p237_p5, %p236_p4 }
   0xe   :  { %p239_p7 = pnand %p238_p6, %p232_p3 }
  0x10   :  { %242 = shalt.err (!%p239_p7)
}
  0x11   :  { %s294_s19 = smov 128   ;;  %s295_s20 = smov 8  }
  0x12   :  { %25 = dma.hbm_to_vmem [thread:$0]  %s356_s0, 256, %s20_s10, [#allocation4], %s294_s19, %s294_s19, %s295_s20  }
  0x13   :  { %s296_s23 = smov [#allocation6]   ;;  %s243_s27 = scalar_lea.hbm %s357_s1, 256 }
  0x14   :  { %s35_s24 = sshll.u32 %s296_s23, 4  ;;  %p244_p8 = scmp.ne.s32.totalorder %s357_s1, %s243_s27  ;;  %s36_s24 = int_to_ptr.vmem [resolvable:$true] %s35_s24 }
  0x15   :  { %p247_p9 = scmp.lt.u32.totalorder %s243_s27, %s357_s1 }
  0x17   :  { %p249_p10 = pnand %p247_p9, %p244_p8 }
  0x19   :  { %252 = shalt.err (!%p249_p10)
}
  0x1a   :  { %s253_s4 = scalar_lea.vmem %s36_s24, 256  ;;  %p258_p12 = scmp.lt.s32.totalorder %s36_s24, %s36_s24 }
  0x1b   :  { %p254_p11 = scmp.ne.s32.totalorder %s36_s24, %s253_s4  ;;  %p259_p13 = scmp.lt.s32.totalorder %s253_s4, %s253_s4 }
  0x1d   :  { %p260_p0 = por %p259_p13, %p258_p12 }
  0x1f   :  { %p261_p1 = pnand %p260_p0, %p254_p11 }
  0x21   :  { %264 = shalt.err (!%p261_p1)
}
  0x22   :  { %41 = dma.hbm_to_vmem [thread:$0]  %s357_s1, 256, %s36_s24, [#allocation7], %s294_s19, %s294_s19, %s295_s20  }
  0x23   :  { %287 = dma.done.wait [#allocation4], 256  }
  0x24   :  { %288 = vsyncadd [#allocation4], 4294967040 }
  0x25   :  { %289 = dma.done.wait [#allocation7], 256  }
  0x26   :  { %290 = vsyncadd [#allocation7], 4294967040  ;;  %v297_v0 = vmov 0.0   ;;  %v57_v1 = vld [vmem:[#allocation3] sm:$0xff]  ;;  %v338_v2 = vld [vmem:[#allocation3 + $0x8] sm:$0xff]  ;;  %s298_s1 = smov [#allocation8]  }
  0x27   :  { %56 = vst [vmem:[#allocation2] sm:$0x1] %v297_v0  ;;  %v80_v3 = vand.u32 2147483647, %v57_v1  ;;  %v81_v4 = vand.u32 2147483647, %v338_v2 }
  0x28   :  { %v59_v13 = vld [vmem:[#allocation6] sm:$0xff]  ;;  %v60_v15 = vld [vmem:[#allocation6 + $0x8] sm:$0xff]  ;;  %vm120_vm0 = vcmp.ge.f32.partialorder %v57_v1, 0.0  ;;  %vm121_vm1 = vcmp.ge.f32.partialorder %v338_v2, 0.0  ;;  %v88_v41 = vmax.f32 %v57_v1, 0.0  ;;  %v89_v43 = vmax.f32 %v338_v2, 0.0 }
  0x29   :  { %v82_v5 = vsub.f32 0.0, %v80_v3  ;;  %v83_v6 = vsub.f32 0.0, %v81_v4  ;;  %v128_v19 = vsub.f32 1.0, %v59_v13  ;;  %v129_v21 = vsub.f32 1.0, %v60_v15  ;;  %s189_s6 = sshll.u32 %s298_s1, 4  ;;  %s190_s6 = int_to_ptr.vmem [resolvable:$true] %s189_s6 }
  0x2a   :  { %v90_v42 = vmul.f32 %v59_v13, %v57_v1  ;;  %v91_v44 = vmul.f32 %v60_v15, %v338_v2  ;;  %v136_v50 = vmul.f32 0.25, %v59_v13  ;;  %v137_v54 = vmul.f32 0.25, %v60_v15  ;;  %s265_s7 = scalar_lea.vmem %s190_s6, 16  ;;  %s269_s8 = scalar_lea.vmem %s190_s6, 32 }
  0x2b   :  { %v84_v7 = vmul.f32 1.442695, %v82_v5  ;;  %v86_v8 = vmul.f32 1.442695, %v83_v6  ;;  %v138_v51 = vmul.f32 0.75, %v128_v19  ;;  %v139_v55 = vmul.f32 0.75, %v129_v21  ;;  %p266_p2 = scmp.ne.s32.totalorder %s190_s6, %s265_s7  ;;  %p270_p3 = scmp.lt.s32.totalorder %s190_s6, %s190_s6 }
  0x2c   :  { %v92_v49 = vsub.f32 %v88_v41, %v90_v42  ;;  %v93_v52 = vsub.f32 %v89_v43, %v91_v44  ;;  %p271_p4 = scmp.lt.s32.totalorder %s269_s8, %s265_s7 }
  0x2d   :  { %205 = vpow2.f32 %v84_v7  ;;  %v140_v58 = vadd.f32 %v138_v51, %v136_v50  ;;  %v141_v61 = vadd.f32 %v139_v55, %v137_v54 }
  0x2e   :  { %207 = vpow2.f32 %v86_v8  ;;  %p272_p5 = por %p271_p4, %p270_p3 }
  0x30   :  { %p273_p6 = pnand %p272_p5, %p266_p2 }
  0x37   :  { %v206_v9 = vpop.eup %205 }
  0x38   :  { %v208_v10 = vpop.eup %207  ;;  %v94_v11 = vadd.f32 1.0, %v206_v9  ;;  %v97_v27 = vmul.f32 -0.5, %v206_v9  ;;  %v100_v36 = vand.u32 2147483647, %v206_v9 }
  0x39   :  { %v103_v12 = vadd.f32 1.0, %v208_v10  ;;  %v106_v29 = vmul.f32 -0.5, %v208_v10  ;;  %v109_v40 = vand.u32 2147483647, %v208_v10 }
  0x3a   :  { %209 = vrcp.f32 %v94_v11  ;;  %v98_v33 = vadd.f32 1.0, %v97_v27  ;;  %vm101_vm2 = vcmp.lt.f32.partialorder %v100_v36, 0.0004427343 }
  0x3b   :  { %211 = vrcp.f32 %v103_v12  ;;  %v107_v37 = vadd.f32 1.0, %v106_v29  ;;  %vm110_vm3 = vcmp.lt.f32.partialorder %v109_v40, 0.0004427343 }
  0x3c   :  { %213 = vlog2.f32 %v94_v11  ;;  %v99_v46 = vmul.f32 %v206_v9, %v98_v33 }
  0x3d   :  { %215 = vlog2.f32 %v103_v12  ;;  %v108_v48 = vmul.f32 %v208_v10, %v107_v37 }
  0x44   :  { %v210_v14 = vpop.eup %209 }
  0x45   :  { %v212_v16 = vpop.eup %211  ;;  %v122_v17 = vmul.f32 %v210_v14, %v206_v9 }
  0x46   :  { %v123_v18 = vmul.f32 %v212_v16, %v208_v10  ;;  %v214_v35 = vpop.eup %213 }
  0x47   :  { %v124_v20 = vsel %vm120_vm0, %v210_v14, %v122_v17  ;;  %v216_v39 = vpop.eup %215  ;;  %v96_v45 = vmul.f32 0.6931472, %v214_v35 }
  0x48   :  { %v125_v22 = vsel %vm121_vm1, %v212_v16, %v123_v18  ;;  %v126_v23 = vmul.f32 %v124_v20, %v59_v13  ;;  %v130_v24 = vsub.f32 1.0, %v124_v20  ;;  %v105_v47 = vmul.f32 0.6931472, %v216_v39 }
  0x49   :  { %v127_v25 = vmul.f32 %v125_v22, %v60_v15  ;;  %v131_v26 = vsub.f32 1.0, %v125_v22  ;;  %v102_v53 = vsel %vm101_vm2, %v99_v46, %v96_v45 }
  0x4a   :  { %v132_v28 = vmul.f32 %v130_v24, %v128_v19  ;;  %v111_v56 = vsel %vm110_vm3, %v108_v48, %v105_v47  ;;  %v112_v57 = vadd.f32 %v102_v53, %v92_v49  ;;  %v166_v19 = vld [vmem:[#allocation2] sm:$0x1] }
  0x4b   :  { %v133_v30 = vmul.f32 %v131_v26, %v129_v21  ;;  %v113_v60 = vadd.f32 %v111_v56, %v93_v52 }
  0x4c   :  { %v134_v31 = vadd.f32 %v132_v28, %v126_v23  ;;  %v160_v4 = vmul.f32 %v140_v58, %v112_v57 }
  0x4d   :  { %v135_v32 = vadd.f32 %v133_v30, %v127_v25  ;;  %v161_v7 = vmul.f32 %v141_v61, %v113_v60 }
  0x4e   :  { %v142_v34 = vsub.f32 1.0, %v134_v31 }
  0x4f   :  { %v143_v38 = vsub.f32 1.0, %v135_v32 }
  0x50   :  { %217 = vrsqrt.f32 %v142_v34  ;;  %vm146_vm4 = vcmp.eq.f32.partialorder %v142_v34, inf  ;;  %v149_v62 = vand.u32 2147483648, %v142_v34  ;;  %vm148_vm5 = vcmp.eq.f32.partialorder %v142_v34, 0.0 }
  0x51   :  { %219 = vrsqrt.f32 %v143_v38  ;;  %vm153_vm6 = vcmp.eq.f32.partialorder %v143_v38, inf  ;;  %v156_v1 = vand.u32 2147483648, %v143_v38  ;;  %vm155_vm7 = vcmp.eq.f32.partialorder %v143_v38, 0.0 }
  0x5a   :  { %v218_v59 = vpop.eup %217 }
  0x5b   :  { %v220_v63 = vpop.eup %219  ;;  %v145_v0 = vmul.f32 %v218_v59, %v142_v34 }
  0x5c   :  { %v152_v2 = vmul.f32 %v220_v63, %v143_v38 }
  0x5d   :  { %v147_v3 = vsel %vm146_vm4, %v142_v34, %v145_v0 }
  0x5e   :  { %v150_v5 = vsel %vm148_vm5, %v149_v62, %v147_v3  ;;  %v154_v6 = vsel %vm153_vm6, %v143_v38, %v152_v2 }
  0x5f   :  { %v157_v8 = vsel %vm155_vm7, %v156_v1, %v154_v6  ;;  %v158_v9 = vmul.f32 %v150_v5, %v142_v34 }
  0x60   :  { %v159_v10 = vmul.f32 %v157_v8, %v143_v38 }
  0x61   :  { %v162_v11 = vmul.f32 %v160_v4, %v158_v9 }
  0x62   :  { %v163_v12 = vmul.f32 %v161_v7, %v159_v10 }
  0x64   :  { %v167_v13 = vadd.f32 %v163_v12, %v162_v11 }
  0x66   :  { %v168_v14 = vrot.slane %v167_v13, 4 }
  0x68   :  { %v169_v15 = vadd.f32 %v168_v14, %v167_v13 }
  0x6a   :  { %v170_v16 = vrot.slane %v169_v15, 2 }
  0x6c   :  { %v171_v17 = vadd.f32 %v170_v16, %v169_v15 }
  0x6e   :  { %v172_v18 = vrot.slane %v171_v17, 1 }
  0x70   :  { %v173_v20 = vadd.f32 %v172_v18, %v171_v17 }
  0x72   :  { %v174_v21 = vadd.f32 %v173_v20, %v166_v19 }
  0x74   :  { %175 = vst [vmem:[#allocation2] sm:$0x1] %v174_v21 }
  0x7b   :  { %v179_v22 = vld [vmem:[#allocation2] sm:$0x1] }
  0x7c   :  { %v181_v23 = vmul.f32 0.00048828125, %v179_v22 }
  0x7e   :  { %182 = vst [vmem:[#allocation8] sm:$0x1] %v181_v23 }
  0x7f   :  { %276 = shalt.err (!%p273_p6)
}
  0x80   :  { %s277_s11 = scalar_lea.hbm %s358_s2, 16 }
  0x81   :  { %p278_p7 = scmp.ne.s32.totalorder %s358_s2, %s277_s11  ;;  %p281_p8 = scmp.lt.u32.totalorder %s277_s11, %s358_s2 }
  0x83   :  { %p283_p9 = pnand %p281_p8, %p278_p7 }
  0x85   :  { %286 = shalt.err (!%p283_p9)
}
  0x86   :  { %192 = dma.vmem_to_hbm [thread:$0]  %s190_s6, 16, %s358_s2, [#allocation5]  }
  0x87   :  { %291 = dma.done.wait [#allocation5], 16  }
  0x88   :  { %292 = vsyncadd [#allocation5], 4294967280 }
  0x89   :  { %196 = vsyncpa [#allocation4], 1 }
  0x8a   :  { %197 = vsyncpa [#allocation7], 1 }
  0x8b   :  { %198 = vsyncpa [#allocation5], 1 }

</bundles_post_ra>
